<compile_context>
chip_gen: v6e
topology: v6e:2x2x1
jax: 0.10.0
libtpu: 0.0.40
codegen_flags: <defaults>
</compile_context>

<pallas_src>
import functools

import jax
import jax.numpy as jnp
import numpy as np
from jax.experimental import pallas as pl
from jax.experimental.pallas import tpu as pltpu

LOG_SIG_MAX = 2.0
LOG_SIG_MIN = -20.0


def _up8(n):
    return ((n + 7) // 8) * 8


def pack_params(params):
    """Pack + algebraically pre-fold the 11 weight/bias tensors (once, at init).

    slab_body: (R, H) f32 -- w_in_x, b_in, w_fold, b_fold, block W/b; each
               section padded to an 8-row (sublane) boundary so every in-kernel
               weight read is a static aligned slice hoisted above the loop.
    slab_head: (H+8, 2Z) f32 -- [W_head ; b_head(padded)], where
               W_head = w_out @ [w_mu | w_ls] and
               b_head = b_out @ [w_mu | w_ls] + [b_mu | b_ls].
    """
    A = params["w_in_x"].shape[0]
    H = params["w_in_h"].shape[0]
    Z = params["w_mu"].shape[1]
    NB = params["w_blk"].shape[0]

    f32 = lambda a: jnp.asarray(a, jnp.float32)

    # ---- algebraic folds (re-association changes only float rounding) ----
    w_fold = f32(params["w_out"]) @ f32(params["w_in_h"])              # (H, H)
    b_fold = f32(params["b_out"]) @ f32(params["w_in_h"])              # (1, H)
    w_mu_ls = jnp.concatenate([f32(params["w_mu"]), f32(params["w_ls"])], axis=1)  # (H, 2Z)
    b_mu_ls = jnp.concatenate([f32(params["b_mu"]), f32(params["b_ls"])], axis=1)  # (1, 2Z)
    w_head = f32(params["w_out"]) @ w_mu_ls                            # (H, 2Z)
    b_head = f32(params["b_out"]) @ w_mu_ls + b_mu_ls                  # (1, 2Z)

    pieces, offsets = [], {}
    row = 0

    def add(name, arr):
        nonlocal row
        rows = _up8(arr.shape[0])
        offsets[name] = row
        pieces.append(jnp.pad(arr, ((0, rows - arr.shape[0]), (0, 0))))
        row += rows

    add("w_in_x", f32(params["w_in_x"]))
    add("b_in", f32(params["b_in"]))
    add("w_fold", w_fold)
    add("b_fold", b_fold)
    for j in range(NB):
        add(f"w_blk{j}", f32(params["w_blk"][j]))
        add(f"b_blk{j}", f32(params["b_blk"][j]))
    slab_body = jnp.concatenate(pieces, axis=0)                        # (R, H)

    slab_head = jnp.concatenate(
        [w_head, jnp.pad(b_head, ((0, 7), (0, 0)))], axis=0)           # (H+8, 2Z)

    packed = dict(slab_body=slab_body, slab_head=slab_head)
    meta = dict(A=A, H=H, Z=Z, NB=NB, offsets=offsets)
    return packed, meta


def _encoder_kernel(x_ref, noise_ref, body_ref, head_ref, out_ref, *,
                    T, Bp, A, H, Z, NB, off):
    # ---- weights: read once, above the recurrence (static aligned slices) ----
    w_in_x = body_ref[off["w_in_x"]:off["w_in_x"] + A, :]              # (A, H)
    b_in = body_ref[off["b_in"]:off["b_in"] + 1, :]                    # (1, H)
    w_fold = body_ref[off["w_fold"]:off["w_fold"] + H, :]              # (H, H)
    b_fold = body_ref[off["b_fold"]:off["b_fold"] + 1, :]              # (1, H)
    w_blk = [body_ref[off[f"w_blk{j}"]:off[f"w_blk{j}"] + H, :] for j in range(NB)]
    b_blk = [body_ref[off[f"b_blk{j}"]:off[f"b_blk{j}"] + 1, :] for j in range(NB)]

    # ---- x-path of fcin hoisted: one MXU push for all T steps, bias folded ----
    # x_ref is (T*Bp, A) time-major, so rows [i*Bp, (i+1)*Bp) belong to step i
    # and every per-step slice below sits on a sublane-group boundary.
    xpre = (jnp.dot(x_ref[...], w_in_x, preferred_element_type=jnp.float32)
            + b_in)                                                    # (T*Bp, H)

    # ---- recurrence: T static -> fully unrolled; carries live in vregs.
    # `hidden` is the pre-fcout state; fcout is folded into w_fold / the head.
    hidden = jnp.zeros((Bp, H), jnp.float32)
    c = jnp.zeros((Bp, H), jnp.float32)
    for i in range(T):
        pre = xpre[i * Bp:(i + 1) * Bp, :]
        if i > 0:
            # h @ w_in_h  ==  (hidden@w_out + b_out) @ w_in_h
            #            ==  hidden @ w_fold + b_fold     (folded at pack time)
            pre = pre + jnp.dot(hidden, w_fold,
                                preferred_element_type=jnp.float32) + b_fold
        hs = jnp.maximum(pre, 0.0)
        cell = jnp.tanh(c * hs)
        for j in range(NB):
            hs = jnp.maximum(
                jnp.dot(hs, w_blk[j], preferred_element_type=jnp.float32)
                + b_blk[j], 0.0)
        cell = cell + jnp.tanh(hs)
        hidden = cell * hs
        c = cell

    # ---- fused head: [mu | log_std] in ONE matmul (fcout folded in) ----
    w_head = head_ref[0:H, :]                                          # (H, 2Z)
    b_head = head_ref[H:H + 1, :]                                      # (1, 2Z)
    head = jnp.dot(hidden, w_head, preferred_element_type=jnp.float32) + b_head
    mu = head[:, 0:Z]
    log_std = head[:, Z:2 * Z]
    std = jnp.exp(jnp.clip(log_std, LOG_SIG_MIN, LOG_SIG_MAX))
    sample = mu + std * noise_ref[...]
    # single lane-contiguous store: [sample | mu | std]
    out_ref[...] = jnp.concatenate([sample, mu, std], axis=-1)         # (Bp, 3Z)


def encoder_forward(skill, noise, packed, meta):
    """skill: (B, T, A) f32; noise: (B, Z) N(0,1) eps for rsample().

    Returns (sample, mu, std), each (B, Z)."""
    B, T, A = skill.shape
    H, Z, NB = meta["H"], meta["Z"], meta["NB"]
    Bp = _up8(B)

    # Layout plumbing only: pad batch to a sublane multiple (free on the MXU),
    # go time-major and merge to (T*Bp, A) so the hoisted x-matmul sees
    # contiguous, 8-row-aligned per-step blocks.
    skill_p = jnp.pad(skill, ((0, Bp - B), (0, 0), (0, 0)))
    noise_p = jnp.pad(noise, ((0, Bp - B), (0, 0)))
    skill_2d = jnp.transpose(skill_p, (1, 0, 2)).reshape(T * Bp, A)

    kernel = functools.partial(
        _encoder_kernel, T=T, Bp=Bp, A=A, H=H, Z=Z, NB=NB, off=meta["offsets"])

    out = pl.pallas_call(
        kernel,
        out_shape=jax.ShapeDtypeStruct((Bp, 3 * Z), jnp.float32),
        in_specs=[pl.BlockSpec(memory_space=pltpu.MemorySpace.VMEM)] * 4,
        out_specs=pl.BlockSpec(memory_space=pltpu.MemorySpace.VMEM),
    )(skill_2d, noise_p, packed["slab_body"], packed["slab_head"])

    sample = out[:B, 0:Z]
    mu = out[:B, Z:2 * Z]
    std = out[:B, 2 * Z:3 * Z]
    return sample, mu, std


def reference(skill, noise, params):
    """Pure-JAX reference mirroring the PyTorch forward (zeros init for h, c)."""
    B, T, A = skill.shape
    H = params["w_in_h"].shape[0]
    h = jnp.zeros((B, H), jnp.float32)
    c = jnp.zeros((B, H), jnp.float32)
    for i in range(T):
        x = skill[:, i, :]
        hidden = jnp.maximum(
            x @ params["w_in_x"] + h @ params["w_in_h"] + params["b_in"], 0.0)
        cell = jnp.tanh(c * hidden)
        for j in range(params["w_blk"].shape[0]):
            hidden = jnp.maximum(
                hidden @ params["w_blk"][j] + params["b_blk"][j], 0.0)
        cell = cell + jnp.tanh(hidden)
        hidden = cell * hidden
        h = hidden @ params["w_out"] + params["b_out"]
        c = cell
    mu = h @ params["w_mu"] + params["b_mu"]
    log_std = h @ params["w_ls"] + params["b_ls"]
    std = jnp.exp(jnp.clip(log_std, LOG_SIG_MIN, LOG_SIG_MAX))
    return mu + std * noise, mu, std


if __name__ == "__main__":
    # Small shapes consistent with the module:
    #   batch B=2, seq T=8, action_dim A=4, hidden_units H=32, z_dim Z=8, blocks=2
    B, T, A, H, Z, NB = 2, 8, 4, 32, 8, 2

    key = jax.random.PRNGKey(0)
    keys = jax.random.split(key, 16)

    def linear(kw, kb, fan_in, fan_out):
        # PyTorch nn.Linear default init: U(-1/sqrt(fan_in), 1/sqrt(fan_in))
        bound = 1.0 / np.sqrt(fan_in)
        w = jax.random.uniform(kw, (fan_in, fan_out), jnp.float32, -bound, bound)
        b = jax.random.uniform(kb, (1, fan_out), jnp.float32, -bound, bound)
        return w, b

    w_in, b_in = linear(keys[0], keys[1], A + H, H)
    wblks, bblks = [], []
    for i in range(NB):
        w, b = linear(keys[2 + 2 * i], keys[3 + 2 * i], H, H)
        wblks.append(w)
        bblks.append(b)

    w_out, b_out = linear(keys[8], keys[9], H, H)
    w_mu, b_mu = linear(keys[10], keys[11], H, Z)
    w_ls, b_ls = linear(keys[12], keys[13], H, Z)

    params = dict(
        w_in_x=w_in[:A], w_in_h=w_in[A:], b_in=b_in,
        w_blk=jnp.stack(wblks), b_blk=jnp.stack(bblks),
        w_out=w_out, b_out=b_out,
        w_mu=w_mu, b_mu=b_mu,
        w_ls=w_ls, b_ls=b_ls,
    )

    skill = jax.random.normal(keys[14], (B, T, A), jnp.float32)
    # Reparameterization noise for density.rsample(): eps ~ N(0, 1)
    noise = jax.random.normal(keys[15], (B, Z), jnp.float32)

    # Pack + pre-fold weights once at init; forward takes the packed slabs.
    packed, meta = pack_params(params)
    fwd = jax.jit(functools.partial(encoder_forward, meta=meta))

    sample, mu, std = fwd(skill, noise, packed)
    jax.block_until_ready((sample, mu, std))

    ref_sample, ref_mu, ref_std = reference(skill, noise, params)
    np.testing.assert_allclose(np.array(mu), np.array(ref_mu), rtol=1e-4, atol=1e-4)
    np.testing.assert_allclose(np.array(std), np.array(ref_std), rtol=1e-4, atol=1e-4)
    np.testing.assert_allclose(np.array(sample), np.array(ref_sample), rtol=1e-4, atol=1e-4)

    print("KERNEL_OK")
</pallas_src>

<mosaic_0001>
module attributes {stable_mosaic.version = 11 : i64} {
  func.func @_encoder_kernel(%arg0: memref<64x4xf32, #tpu.memory_space<vmem>>, %arg1: memref<8x8xf32, #tpu.memory_space<vmem>>, %arg2: memref<136x32xf32, #tpu.memory_space<vmem>>, %arg3: memref<40x16xf32, #tpu.memory_space<vmem>>, %arg4: memref<8x24xf32, #tpu.memory_space<vmem>>) attributes {dimension_semantics = [], scalar_prefetch = 0 : i64, scratch_operands = 0 : i64, tpu.core_type = #tpu.core_type<tc>} {
    %c0 = arith.constant 0 : index
    %c0_0 = arith.constant 0 : index
    %0 = vector.load %arg2[%c0, %c0_0] : memref<136x32xf32, #tpu.memory_space<vmem>>, vector<4x32xf32>
    %c8 = arith.constant 8 : index
    %c0_1 = arith.constant 0 : index
    %1 = vector.load %arg2[%c8, %c0_1] : memref<136x32xf32, #tpu.memory_space<vmem>>, vector<1x32xf32>
    %c16 = arith.constant 16 : index
    %c0_2 = arith.constant 0 : index
    %2 = vector.load %arg2[%c16, %c0_2] : memref<136x32xf32, #tpu.memory_space<vmem>>, vector<32x32xf32>
    %c48 = arith.constant 48 : index
    %c0_3 = arith.constant 0 : index
    %3 = vector.load %arg2[%c48, %c0_3] : memref<136x32xf32, #tpu.memory_space<vmem>>, vector<1x32xf32>
    %c56 = arith.constant 56 : index
    %c0_4 = arith.constant 0 : index
    %4 = vector.load %arg2[%c56, %c0_4] : memref<136x32xf32, #tpu.memory_space<vmem>>, vector<32x32xf32>
    %c96 = arith.constant 96 : index
    %c0_5 = arith.constant 0 : index
    %5 = vector.load %arg2[%c96, %c0_5] : memref<136x32xf32, #tpu.memory_space<vmem>>, vector<32x32xf32>
    %c88 = arith.constant 88 : index
    %c0_6 = arith.constant 0 : index
    %6 = vector.load %arg2[%c88, %c0_6] : memref<136x32xf32, #tpu.memory_space<vmem>>, vector<1x32xf32>
    %c128 = arith.constant 128 : index
    %c0_7 = arith.constant 0 : index
    %7 = vector.load %arg2[%c128, %c0_7] : memref<136x32xf32, #tpu.memory_space<vmem>>, vector<1x32xf32>
    %c0_8 = arith.constant 0 : index
    %c0_9 = arith.constant 0 : index
    %8 = vector.load %arg0[%c0_8, %c0_9] : memref<64x4xf32, #tpu.memory_space<vmem>>, vector<64x4xf32>
    %cst = arith.constant dense<0.000000e+00> : vector<64x32xf32>
    %9 = tpu.matmul %8, %0, %cst {dimension_numbers = #tpu.dot_dimension_numbers<[1], [0], [0], [1], [0, 0, 1, 1], [], []>} : vector<64x4xf32>, vector<4x32xf32>, vector<64x32xf32> -> vector<64x32xf32>
    %10 = vector.broadcast %1 : vector<1x32xf32> to vector<64x32xf32>
    %11 = arith.addf %9, %10 : vector<64x32xf32>
    %cst_10 = arith.constant 0.000000e+00 : f32
    %12 = vector.broadcast %cst_10 : f32 to vector<8x32xf32>
    %13 = vector.extract_strided_slice %11 {offsets = [0, 0], sizes = [8, 32], strides = [1, 1]} : vector<64x32xf32> to vector<8x32xf32>
    %cst_11 = arith.constant 0.000000e+00 : f32
    %14 = vector.broadcast %cst_11 : f32 to vector<8x32xf32>
    %15 = arith.maximumf %13, %14 : vector<8x32xf32>
    %16 = arith.mulf %12, %15 : vector<8x32xf32>
    %17 = math.tanh %16 : vector<8x32xf32>
    %cst_12 = arith.constant dense<0.000000e+00> : vector<8x32xf32>
    %18 = tpu.matmul %15, %4, %cst_12 {dimension_numbers = #tpu.dot_dimension_numbers<[1], [0], [0], [1], [0, 0, 1, 1], [], []>} : vector<8x32xf32>, vector<32x32xf32>, vector<8x32xf32> -> vector<8x32xf32>
    %19 = vector.broadcast %6 : vector<1x32xf32> to vector<8x32xf32>
    %20 = arith.addf %18, %19 : vector<8x32xf32>
    %cst_13 = arith.constant 0.000000e+00 : f32
    %21 = vector.broadcast %cst_13 : f32 to vector<8x32xf32>
    %22 = arith.maximumf %20, %21 : vector<8x32xf32>
    %cst_14 = arith.constant dense<0.000000e+00> : vector<8x32xf32>
    %23 = tpu.matmul %22, %5, %cst_14 {dimension_numbers = #tpu.dot_dimension_numbers<[1], [0], [0], [1], [0, 0, 1, 1], [], []>} : vector<8x32xf32>, vector<32x32xf32>, vector<8x32xf32> -> vector<8x32xf32>
    %24 = vector.broadcast %7 : vector<1x32xf32> to vector<8x32xf32>
    %25 = arith.addf %23, %24 : vector<8x32xf32>
    %cst_15 = arith.constant 0.000000e+00 : f32
    %26 = vector.broadcast %cst_15 : f32 to vector<8x32xf32>
    %27 = arith.maximumf %25, %26 : vector<8x32xf32>
    %28 = math.tanh %27 : vector<8x32xf32>
    %29 = arith.addf %17, %28 : vector<8x32xf32>
    %30 = arith.mulf %29, %27 : vector<8x32xf32>
    %31 = vector.extract_strided_slice %11 {offsets = [8, 0], sizes = [8, 32], strides = [1, 1]} : vector<64x32xf32> to vector<8x32xf32>
    %cst_16 = arith.constant dense<0.000000e+00> : vector<8x32xf32>
    %32 = tpu.matmul %30, %2, %cst_16 {dimension_numbers = #tpu.dot_dimension_numbers<[1], [0], [0], [1], [0, 0, 1, 1], [], []>} : vector<8x32xf32>, vector<32x32xf32>, vector<8x32xf32> -> vector<8x32xf32>
    %33 = arith.addf %31, %32 : vector<8x32xf32>
    %34 = vector.broadcast %3 : vector<1x32xf32> to vector<8x32xf32>
    %35 = arith.addf %33, %34 : vector<8x32xf32>
    %cst_17 = arith.constant 0.000000e+00 : f32
    %36 = vector.broadcast %cst_17 : f32 to vector<8x32xf32>
    %37 = arith.maximumf %35, %36 : vector<8x32xf32>
    %38 = arith.mulf %29, %37 : vector<8x32xf32>
    %39 = math.tanh %38 : vector<8x32xf32>
    %cst_18 = arith.constant dense<0.000000e+00> : vector<8x32xf32>
    %40 = tpu.matmul %37, %4, %cst_18 {dimension_numbers = #tpu.dot_dimension_numbers<[1], [0], [0], [1], [0, 0, 1, 1], [], []>} : vector<8x32xf32>, vector<32x32xf32>, vector<8x32xf32> -> vector<8x32xf32>
    %41 = vector.broadcast %6 : vector<1x32xf32> to vector<8x32xf32>
    %42 = arith.addf %40, %41 : vector<8x32xf32>
    %cst_19 = arith.constant 0.000000e+00 : f32
    %43 = vector.broadcast %cst_19 : f32 to vector<8x32xf32>
    %44 = arith.maximumf %42, %43 : vector<8x32xf32>
    %cst_20 = arith.constant dense<0.000000e+00> : vector<8x32xf32>
    %45 = tpu.matmul %44, %5, %cst_20 {dimension_numbers = #tpu.dot_dimension_numbers<[1], [0], [0], [1], [0, 0, 1, 1], [], []>} : vector<8x32xf32>, vector<32x32xf32>, vector<8x32xf32> -> vector<8x32xf32>
    %46 = vector.broadcast %7 : vector<1x32xf32> to vector<8x32xf32>
    %47 = arith.addf %45, %46 : vector<8x32xf32>
    %cst_21 = arith.constant 0.000000e+00 : f32
    %48 = vector.broadcast %cst_21 : f32 to vector<8x32xf32>
    %49 = arith.maximumf %47, %48 : vector<8x32xf32>
    %50 = math.tanh %49 : vector<8x32xf32>
    %51 = arith.addf %39, %50 : vector<8x32xf32>
    %52 = arith.mulf %51, %49 : vector<8x32xf32>
    %53 = vector.extract_strided_slice %11 {offsets = [16, 0], sizes = [8, 32], strides = [1, 1]} : vector<64x32xf32> to vector<8x32xf32>
    %cst_22 = arith.constant dense<0.000000e+00> : vector<8x32xf32>
    %54 = tpu.matmul %52, %2, %cst_22 {dimension_numbers = #tpu.dot_dimension_numbers<[1], [0], [0], [1], [0, 0, 1, 1], [], []>} : vector<8x32xf32>, vector<32x32xf32>, vector<8x32xf32> -> vector<8x32xf32>
    %55 = arith.addf %53, %54 : vector<8x32xf32>
    %56 = vector.broadcast %3 : vector<1x32xf32> to vector<8x32xf32>
    %57 = arith.addf %55, %56 : vector<8x32xf32>
    %cst_23 = arith.constant 0.000000e+00 : f32
    %58 = vector.broadcast %cst_23 : f32 to vector<8x32xf32>
    %59 = arith.maximumf %57, %58 : vector<8x32xf32>
    %60 = arith.mulf %51, %59 : vector<8x32xf32>
    %61 = math.tanh %60 : vector<8x32xf32>
    %cst_24 = arith.constant dense<0.000000e+00> : vector<8x32xf32>
    %62 = tpu.matmul %59, %4, %cst_24 {dimension_numbers = #tpu.dot_dimension_numbers<[1], [0], [0], [1], [0, 0, 1, 1], [], []>} : vector<8x32xf32>, vector<32x32xf32>, vector<8x32xf32> -> vector<8x32xf32>
    %63 = vector.broadcast %6 : vector<1x32xf32> to vector<8x32xf32>
    %64 = arith.addf %62, %63 : vector<8x32xf32>
    %cst_25 = arith.constant 0.000000e+00 : f32
    %65 = vector.broadcast %cst_25 : f32 to vector<8x32xf32>
    %66 = arith.maximumf %64, %65 : vector<8x32xf32>
    %cst_26 = arith.constant dense<0.000000e+00> : vector<8x32xf32>
    %67 = tpu.matmul %66, %5, %cst_26 {dimension_numbers = #tpu.dot_dimension_numbers<[1], [0], [0], [1], [0, 0, 1, 1], [], []>} : vector<8x32xf32>, vector<32x32xf32>, vector<8x32xf32> -> vector<8x32xf32>
    %68 = vector.broadcast %7 : vector<1x32xf32> to vector<8x32xf32>
    %69 = arith.addf %67, %68 : vector<8x32xf32>
    %cst_27 = arith.constant 0.000000e+00 : f32
    %70 = vector.broadcast %cst_27 : f32 to vector<8x32xf32>
    %71 = arith.maximumf %69, %70 : vector<8x32xf32>
    %72 = math.tanh %71 : vector<8x32xf32>
    %73 = arith.addf %61, %72 : vector<8x32xf32>
    %74 = arith.mulf %73, %71 : vector<8x32xf32>
    %75 = vector.extract_strided_slice %11 {offsets = [24, 0], sizes = [8, 32], strides = [1, 1]} : vector<64x32xf32> to vector<8x32xf32>
    %cst_28 = arith.constant dense<0.000000e+00> : vector<8x32xf32>
    %76 = tpu.matmul %74, %2, %cst_28 {dimension_numbers = #tpu.dot_dimension_numbers<[1], [0], [0], [1], [0, 0, 1, 1], [], []>} : vector<8x32xf32>, vector<32x32xf32>, vector<8x32xf32> -> vector<8x32xf32>
    %77 = arith.addf %75, %76 : vector<8x32xf32>
    %78 = vector.broadcast %3 : vector<1x32xf32> to vector<8x32xf32>
    %79 = arith.addf %77, %78 : vector<8x32xf32>
    %cst_29 = arith.constant 0.000000e+00 : f32
    %80 = vector.broadcast %cst_29 : f32 to vector<8x32xf32>
    %81 = arith.maximumf %79, %80 : vector<8x32xf32>
    %82 = arith.mulf %73, %81 : vector<8x32xf32>
    %83 = math.tanh %82 : vector<8x32xf32>
    %cst_30 = arith.constant dense<0.000000e+00> : vector<8x32xf32>
    %84 = tpu.matmul %81, %4, %cst_30 {dimension_numbers = #tpu.dot_dimension_numbers<[1], [0], [0], [1], [0, 0, 1, 1], [], []>} : vector<8x32xf32>, vector<32x32xf32>, vector<8x32xf32> -> vector<8x32xf32>
    %85 = vector.broadcast %6 : vector<1x32xf32> to vector<8x32xf32>
    %86 = arith.addf %84, %85 : vector<8x32xf32>
    %cst_31 = arith.constant 0.000000e+00 : f32
    %87 = vector.broadcast %cst_31 : f32 to vector<8x32xf32>
    %88 = arith.maximumf %86, %87 : vector<8x32xf32>
    %cst_32 = arith.constant dense<0.000000e+00> : vector<8x32xf32>
    %89 = tpu.matmul %88, %5, %cst_32 {dimension_numbers = #tpu.dot_dimension_numbers<[1], [0], [0], [1], [0, 0, 1, 1], [], []>} : vector<8x32xf32>, vector<32x32xf32>, vector<8x32xf32> -> vector<8x32xf32>
    %90 = vector.broadcast %7 : vector<1x32xf32> to vector<8x32xf32>
    %91 = arith.addf %89, %90 : vector<8x32xf32>
    %cst_33 = arith.constant 0.000000e+00 : f32
    %92 = vector.broadcast %cst_33 : f32 to vector<8x32xf32>
    %93 = arith.maximumf %91, %92 : vector<8x32xf32>
    %94 = math.tanh %93 : vector<8x32xf32>
    %95 = arith.addf %83, %94 : vector<8x32xf32>
    %96 = arith.mulf %95, %93 : vector<8x32xf32>
    %97 = vector.extract_strided_slice %11 {offsets = [32, 0], sizes = [8, 32], strides = [1, 1]} : vector<64x32xf32> to vector<8x32xf32>
    %cst_34 = arith.constant dense<0.000000e+00> : vector<8x32xf32>
    %98 = tpu.matmul %96, %2, %cst_34 {dimension_numbers = #tpu.dot_dimension_numbers<[1], [0], [0], [1], [0, 0, 1, 1], [], []>} : vector<8x32xf32>, vector<32x32xf32>, vector<8x32xf32> -> vector<8x32xf32>
    %99 = arith.addf %97, %98 : vector<8x32xf32>
    %100 = vector.broadcast %3 : vector<1x32xf32> to vector<8x32xf32>
    %101 = arith.addf %99, %100 : vector<8x32xf32>
    %cst_35 = arith.constant 0.000000e+00 : f32
    %102 = vector.broadcast %cst_35 : f32 to vector<8x32xf32>
    %103 = arith.maximumf %101, %102 : vector<8x32xf32>
    %104 = arith.mulf %95, %103 : vector<8x32xf32>
    %105 = math.tanh %104 : vector<8x32xf32>
    %cst_36 = arith.constant dense<0.000000e+00> : vector<8x32xf32>
    %106 = tpu.matmul %103, %4, %cst_36 {dimension_numbers = #tpu.dot_dimension_numbers<[1], [0], [0], [1], [0, 0, 1, 1], [], []>} : vector<8x32xf32>, vector<32x32xf32>, vector<8x32xf32> -> vector<8x32xf32>
    %107 = vector.broadcast %6 : vector<1x32xf32> to vector<8x32xf32>
    %108 = arith.addf %106, %107 : vector<8x32xf32>
    %cst_37 = arith.constant 0.000000e+00 : f32
    %109 = vector.broadcast %cst_37 : f32 to vector<8x32xf32>
    %110 = arith.maximumf %108, %109 : vector<8x32xf32>
    %cst_38 = arith.constant dense<0.000000e+00> : vector<8x32xf32>
    %111 = tpu.matmul %110, %5, %cst_38 {dimension_numbers = #tpu.dot_dimension_numbers<[1], [0], [0], [1], [0, 0, 1, 1], [], []>} : vector<8x32xf32>, vector<32x32xf32>, vector<8x32xf32> -> vector<8x32xf32>
    %112 = vector.broadcast %7 : vector<1x32xf32> to vector<8x32xf32>
    %113 = arith.addf %111, %112 : vector<8x32xf32>
    %cst_39 = arith.constant 0.000000e+00 : f32
    %114 = vector.broadcast %cst_39 : f32 to vector<8x32xf32>
    %115 = arith.maximumf %113, %114 : vector<8x32xf32>
    %116 = math.tanh %115 : vector<8x32xf32>
    %117 = arith.addf %105, %116 : vector<8x32xf32>
    %118 = arith.mulf %117, %115 : vector<8x32xf32>
    %119 = vector.extract_strided_slice %11 {offsets = [40, 0], sizes = [8, 32], strides = [1, 1]} : vector<64x32xf32> to vector<8x32xf32>
    %cst_40 = arith.constant dense<0.000000e+00> : vector<8x32xf32>
    %120 = tpu.matmul %118, %2, %cst_40 {dimension_numbers = #tpu.dot_dimension_numbers<[1], [0], [0], [1], [0, 0, 1, 1], [], []>} : vector<8x32xf32>, vector<32x32xf32>, vector<8x32xf32> -> vector<8x32xf32>
    %121 = arith.addf %119, %120 : vector<8x32xf32>
    %122 = vector.broadcast %3 : vector<1x32xf32> to vector<8x32xf32>
    %123 = arith.addf %121, %122 : vector<8x32xf32>
    %cst_41 = arith.constant 0.000000e+00 : f32
    %124 = vector.broadcast %cst_41 : f32 to vector<8x32xf32>
    %125 = arith.maximumf %123, %124 : vector<8x32xf32>
    %126 = arith.mulf %117, %125 : vector<8x32xf32>
    %127 = math.tanh %126 : vector<8x32xf32>
    %cst_42 = arith.constant dense<0.000000e+00> : vector<8x32xf32>
    %128 = tpu.matmul %125, %4, %cst_42 {dimension_numbers = #tpu.dot_dimension_numbers<[1], [0], [0], [1], [0, 0, 1, 1], [], []>} : vector<8x32xf32>, vector<32x32xf32>, vector<8x32xf32> -> vector<8x32xf32>
    %129 = vector.broadcast %6 : vector<1x32xf32> to vector<8x32xf32>
    %130 = arith.addf %128, %129 : vector<8x32xf32>
    %cst_43 = arith.constant 0.000000e+00 : f32
    %131 = vector.broadcast %cst_43 : f32 to vector<8x32xf32>
    %132 = arith.maximumf %130, %131 : vector<8x32xf32>
    %cst_44 = arith.constant dense<0.000000e+00> : vector<8x32xf32>
    %133 = tpu.matmul %132, %5, %cst_44 {dimension_numbers = #tpu.dot_dimension_numbers<[1], [0], [0], [1], [0, 0, 1, 1], [], []>} : vector<8x32xf32>, vector<32x32xf32>, vector<8x32xf32> -> vector<8x32xf32>
    %134 = vector.broadcast %7 : vector<1x32xf32> to vector<8x32xf32>
    %135 = arith.addf %133, %134 : vector<8x32xf32>
    %cst_45 = arith.constant 0.000000e+00 : f32
    %136 = vector.broadcast %cst_45 : f32 to vector<8x32xf32>
    %137 = arith.maximumf %135, %136 : vector<8x32xf32>
    %138 = math.tanh %137 : vector<8x32xf32>
    %139 = arith.addf %127, %138 : vector<8x32xf32>
    %140 = arith.mulf %139, %137 : vector<8x32xf32>
    %141 = vector.extract_strided_slice %11 {offsets = [48, 0], sizes = [8, 32], strides = [1, 1]} : vector<64x32xf32> to vector<8x32xf32>
    %cst_46 = arith.constant dense<0.000000e+00> : vector<8x32xf32>
    %142 = tpu.matmul %140, %2, %cst_46 {dimension_numbers = #tpu.dot_dimension_numbers<[1], [0], [0], [1], [0, 0, 1, 1], [], []>} : vector<8x32xf32>, vector<32x32xf32>, vector<8x32xf32> -> vector<8x32xf32>
    %143 = arith.addf %141, %142 : vector<8x32xf32>
    %144 = vector.broadcast %3 : vector<1x32xf32> to vector<8x32xf32>
    %145 = arith.addf %143, %144 : vector<8x32xf32>
    %cst_47 = arith.constant 0.000000e+00 : f32
    %146 = vector.broadcast %cst_47 : f32 to vector<8x32xf32>
    %147 = arith.maximumf %145, %146 : vector<8x32xf32>
    %148 = arith.mulf %139, %147 : vector<8x32xf32>
    %149 = math.tanh %148 : vector<8x32xf32>
    %cst_48 = arith.constant dense<0.000000e+00> : vector<8x32xf32>
    %150 = tpu.matmul %147, %4, %cst_48 {dimension_numbers = #tpu.dot_dimension_numbers<[1], [0], [0], [1], [0, 0, 1, 1], [], []>} : vector<8x32xf32>, vector<32x32xf32>, vector<8x32xf32> -> vector<8x32xf32>
    %151 = vector.broadcast %6 : vector<1x32xf32> to vector<8x32xf32>
    %152 = arith.addf %150, %151 : vector<8x32xf32>
    %cst_49 = arith.constant 0.000000e+00 : f32
    %153 = vector.broadcast %cst_49 : f32 to vector<8x32xf32>
    %154 = arith.maximumf %152, %153 : vector<8x32xf32>
    %cst_50 = arith.constant dense<0.000000e+00> : vector<8x32xf32>
    %155 = tpu.matmul %154, %5, %cst_50 {dimension_numbers = #tpu.dot_dimension_numbers<[1], [0], [0], [1], [0, 0, 1, 1], [], []>} : vector<8x32xf32>, vector<32x32xf32>, vector<8x32xf32> -> vector<8x32xf32>
    %156 = vector.broadcast %7 : vector<1x32xf32> to vector<8x32xf32>
    %157 = arith.addf %155, %156 : vector<8x32xf32>
    %cst_51 = arith.constant 0.000000e+00 : f32
    %158 = vector.broadcast %cst_51 : f32 to vector<8x32xf32>
    %159 = arith.maximumf %157, %158 : vector<8x32xf32>
    %160 = math.tanh %159 : vector<8x32xf32>
    %161 = arith.addf %149, %160 : vector<8x32xf32>
    %162 = arith.mulf %161, %159 : vector<8x32xf32>
    %163 = vector.extract_strided_slice %11 {offsets = [56, 0], sizes = [8, 32], strides = [1, 1]} : vector<64x32xf32> to vector<8x32xf32>
    %cst_52 = arith.constant dense<0.000000e+00> : vector<8x32xf32>
    %164 = tpu.matmul %162, %2, %cst_52 {dimension_numbers = #tpu.dot_dimension_numbers<[1], [0], [0], [1], [0, 0, 1, 1], [], []>} : vector<8x32xf32>, vector<32x32xf32>, vector<8x32xf32> -> vector<8x32xf32>
    %165 = arith.addf %163, %164 : vector<8x32xf32>
    %166 = vector.broadcast %3 : vector<1x32xf32> to vector<8x32xf32>
    %167 = arith.addf %165, %166 : vector<8x32xf32>
    %cst_53 = arith.constant 0.000000e+00 : f32
    %168 = vector.broadcast %cst_53 : f32 to vector<8x32xf32>
    %169 = arith.maximumf %167, %168 : vector<8x32xf32>
    %170 = arith.mulf %161, %169 : vector<8x32xf32>
    %171 = math.tanh %170 : vector<8x32xf32>
    %cst_54 = arith.constant dense<0.000000e+00> : vector<8x32xf32>
    %172 = tpu.matmul %169, %4, %cst_54 {dimension_numbers = #tpu.dot_dimension_numbers<[1], [0], [0], [1], [0, 0, 1, 1], [], []>} : vector<8x32xf32>, vector<32x32xf32>, vector<8x32xf32> -> vector<8x32xf32>
    %173 = vector.broadcast %6 : vector<1x32xf32> to vector<8x32xf32>
    %174 = arith.addf %172, %173 : vector<8x32xf32>
    %cst_55 = arith.constant 0.000000e+00 : f32
    %175 = vector.broadcast %cst_55 : f32 to vector<8x32xf32>
    %176 = arith.maximumf %174, %175 : vector<8x32xf32>
    %cst_56 = arith.constant dense<0.000000e+00> : vector<8x32xf32>
    %177 = tpu.matmul %176, %5, %cst_56 {dimension_numbers = #tpu.dot_dimension_numbers<[1], [0], [0], [1], [0, 0, 1, 1], [], []>} : vector<8x32xf32>, vector<32x32xf32>, vector<8x32xf32> -> vector<8x32xf32>
    %178 = vector.broadcast %7 : vector<1x32xf32> to vector<8x32xf32>
    %179 = arith.addf %177, %178 : vector<8x32xf32>
    %cst_57 = arith.constant 0.000000e+00 : f32
    %180 = vector.broadcast %cst_57 : f32 to vector<8x32xf32>
    %181 = arith.maximumf %179, %180 : vector<8x32xf32>
    %182 = math.tanh %181 : vector<8x32xf32>
    %183 = arith.addf %171, %182 : vector<8x32xf32>
    %184 = arith.mulf %183, %181 : vector<8x32xf32>
    %c0_58 = arith.constant 0 : index
    %c0_59 = arith.constant 0 : index
    %185 = vector.load %arg3[%c0_58, %c0_59] : memref<40x16xf32, #tpu.memory_space<vmem>>, vector<32x16xf32>
    %c32 = arith.constant 32 : index
    %c0_60 = arith.constant 0 : index
    %186 = vector.load %arg3[%c32, %c0_60] : memref<40x16xf32, #tpu.memory_space<vmem>>, vector<1x16xf32>
    %cst_61 = arith.constant dense<0.000000e+00> : vector<8x16xf32>
    %187 = tpu.matmul %184, %185, %cst_61 {dimension_numbers = #tpu.dot_dimension_numbers<[1], [0], [0], [1], [0, 0, 1, 1], [], []>} : vector<8x32xf32>, vector<32x16xf32>, vector<8x16xf32> -> vector<8x16xf32>
    %188 = vector.broadcast %186 : vector<1x16xf32> to vector<8x16xf32>
    %189 = arith.addf %187, %188 : vector<8x16xf32>
    %190 = vector.extract_strided_slice %189 {offsets = [0, 0], sizes = [8, 8], strides = [1, 1]} : vector<8x16xf32> to vector<8x8xf32>
    %191 = vector.extract_strided_slice %189 {offsets = [0, 8], sizes = [8, 8], strides = [1, 1]} : vector<8x16xf32> to vector<8x8xf32>
    %cst_62 = arith.constant -2.000000e+01 : f32
    %cst_63 = arith.constant 2.000000e+00 : f32
    %192 = vector.broadcast %cst_62 : f32 to vector<8x8xf32>
    %193 = arith.maximumf %192, %191 : vector<8x8xf32>
    %194 = vector.broadcast %cst_63 : f32 to vector<8x8xf32>
    %195 = arith.minimumf %194, %193 : vector<8x8xf32>
    %196 = math.exp %195 : vector<8x8xf32>
    %c0_64 = arith.constant 0 : index
    %c0_65 = arith.constant 0 : index
    %197 = vector.load %arg1[%c0_64, %c0_65] : memref<8x8xf32, #tpu.memory_space<vmem>>, vector<8x8xf32>
    %198 = arith.mulf %196, %197 : vector<8x8xf32>
    %199 = arith.addf %190, %198 : vector<8x8xf32>
    %200 = tpu.concatenate %199, %190, %196 in 1 : vector<8x8xf32>, vector<8x8xf32>, vector<8x8xf32> -> vector<8x24xf32>
    %c0_66 = arith.constant 0 : index
    %c0_67 = arith.constant 0 : index
    %201 = vector.load %arg4[%c0_66, %c0_67] : memref<8x24xf32, #tpu.memory_space<vmem>>, vector<8x24xf32>
    tpu.vector_store %arg4[%c0_66, %c0_67], %200 {strides = array<i32>} : memref<8x24xf32, #tpu.memory_space<vmem>>, vector<8x24xf32>,
    return
  }
}

</mosaic_0001>

<bundles_post_ra>
// kernel: encoder_forward.1
= control target key start
LH: loop header
LB: loop body
LE: loop exit
PB: predicated region body
PF: predicated region fallthrough
CT: control target
= control target key end

     0   :  { %vm71_vm0 = vcmask 1043456   ;;  %vm46_vm1 = vcmask 31744   ;;  %v2548_v3 = vmov 0.0   ;;  %vm2549_vm2 = vmmov 0   ;;  %s2550_s21 = smov 8   ;;  %s3022_s2 = inlined_call_operand.vmem [shape: f32[136,32], index: 2, kind: input, shape index: {}]   ;;  %s3023_s0 = inlined_call_operand.vmem [shape: f32[64,4], index: 0, kind: input, shape index: {}]   ;;  %s3024_s3 = inlined_call_operand.vmem [shape: f32[40,16], index: 3, kind: input, shape index: {}]   ;;  %s3025_s1 = inlined_call_operand.vmem [shape: f32[8,8], index: 1, kind: input, shape index: {}]   ;;  %s3026_s4 = inlined_call_operand.vmem [shape: f32[8,24], index: 4, kind: output, shape index: {}]  }
   0x1   :  { %v17_v0 = vld [vmem:[%s3022_s2] sm:$0xf]  ;;  %v35_v2 = vld [vmem:[%s3023_s0 + $0x8] sm:$0xff]  ;;  %2246 = vmatprep.subr.mxu1 %v2548_v3  ;;  %v2593_v4 = vld [vmem:[%s3022_s2 + $0x50] sm:$0xff]  ;;  %2254 = vmatprep.mubr.msk.f32.mxu1 %vm2549_vm2, %v2548_v3  ;;  %vm187_vm3 = vcmask 261120   ;;  %vm2055_vm4 = vcmask 64512  }
   0x2   :  { %v34_v1 = vld [vmem:[%s3023_s0] sm:$0xff]  ;;  %2232 = vmatprep.subr.msk.mxu0 %vm71_vm0, %v17_v0  ;;  %2247 = vmatpush3.msra.mxu1 %v2593_v4  ;;  %v2600_v5 = vld [vmem:[%s3022_s2 + $0x48] sm:$0xff]  ;;  %v2614_v7 = vld [vmem:[%s3022_s2 + $0x38] sm:$0xff]  ;;  %vm2057_vm5 = vcmask 130048   ;;  %vm2059_vm6 = vcmask 195584  }
   0x3   :  { %2234 = vmatprep.mubr.msk.f32.mxu0 %vm46_vm1, %v34_v1  ;;  %2233 = vmatpush3.msk.msra.mxu0 %vm71_vm0, %v17_v0  ;;  %v2607_v6 = vld [vmem:[%s3022_s2 + $0x40] sm:$0xff]  ;;  %v2625_v9 = vld [vmem:[%s3022_s2 + $0x8] ss:$0 sm:$0xff]  ;;  %v2631_v13 = vld [vmem:[%s3022_s2 + $0x78] sm:$0xff] }
   0x4   :  { %2235 = vmatmul.mubr.msk.f32.vlgmr.msra.gmra.mxu0 %vm46_vm1, %v35_v2  ;;  %2268 = vmatprep.subr.mxu0 %v2548_v3  ;;  %v2641_v14 = vld [vmem:[%s3022_s2 + $0x70] sm:$0xff]  ;;  %v2648_v15 = vld [vmem:[%s3022_s2 + $0x68] sm:$0xff]  ;;  %v2655_v16 = vld [vmem:[%s3022_s2 + $0x60] sm:$0xff] }
   0x5   :  { %2248 = vmatprep.subr.mxu1 %v2548_v3  ;;  %v2662_v17 = vld [vmem:[%s3022_s2 + $0x58] ss:$0 sm:$0xff]  ;;  %v36_v22 = vld [vmem:[%s3023_s0 + $0x10] sm:$0xff]  ;;  %v38_v24 = vld [vmem:[%s3023_s0 + $0x20] sm:$0xff] }
   0x6   :  { %2249 = vmatpush3.msra.mxu1 %v2600_v5  ;;  %2237 = vmatprep.mubr.msk.f32.mxu0 %vm46_vm1, %v36_v22  ;;  %v37_v23 = vld [vmem:[%s3023_s0 + $0x18] sm:$0xff]  ;;  %v39_v25 = vld [vmem:[%s3023_s0 + $0x28] sm:$0xff]  ;;  %v40_v27 = vld [vmem:[%s3023_s0 + $0x30] sm:$0xff] }
   0x7   :  { %2250 = vmatprep.subr.mxu1 %v2548_v3  ;;  %v2695_v26 = vld [vmem:[%s3022_s2 + $0x28] sm:$0xff]  ;;  %v41_v28 = vld [vmem:[%s3023_s0 + $0x38] sm:$0xff]  ;;  %v2709_v29 = vld [vmem:[%s3022_s2 + $0x20] sm:$0xff] }
   0x8   :  { %2251 = vmatpush3.msra.mxu1 %v2607_v6  ;;  %2238 = vmatmul.mubr.msk.f32.gmra.mxu0 %vm46_vm1, %v37_v23  ;;  %v2719_v30 = vld [vmem:[%s3022_s2 + $0x18] sm:$0xff]  ;;  %v2726_v31 = vld [vmem:[%s3022_s2 + $0x10] sm:$0xff]  ;;  %v2733_v32 = vld [vmem:[%s3022_s2 + $0x80] ss:$0 sm:$0xff] }
   0x9   :  { %2252 = vmatprep.subr.mxu1 %v2548_v3  ;;  %2240 = vmatprep.mubr.msk.f32.mxu0 %vm46_vm1, %v38_v24  ;;  %v2762_v49 = vld [vmem:[%s3022_s2 + $0x30] ss:$0 sm:$0xff] }
   0xa   :  { %2253 = vmatpush3.msra.mxu1 %v2614_v7  ;;  %2269 = vmatpush3.msra.mxu0 %v2695_v26 }
   0xb   :  { %2257 = vmatprep.subr.mxu1 %v2548_v3  ;;  %2270 = vmatprep.subr.mxu0 %v2548_v3 }
   0xc   :  { %2241 = vmatmul.mubr.msk.f32.gmra.mxu0 %vm46_vm1, %v39_v25 }
   0xd   :  { %2243 = vmatprep.mubr.msk.f32.mxu0 %vm46_vm1, %v40_v27  ;;  %2271 = vmatpush3.msra.mxu0 %v2709_v29 }
   0xe   :  { %2272 = vmatprep.subr.mxu0 %v2548_v3 }
   0xf   :  { %2273 = vmatpush3.msra.mxu0 %v2719_v30 }
  0x10   :  { %2244 = vmatmul.mubr.msk.f32.gmra.mxu0 %vm46_vm1, %v41_v28  ;;  %2274 = vmatprep.subr.mxu0 %v2548_v3 }
  0x11   :  { %2276 = vmatprep.mubr.msk.f32.mxu0 %vm2549_vm2, %v2548_v3  ;;  %2275 = vmatpush3.msra.mxu0 %v2726_v31 }
  0x12   :  { %2290 = vmatprep.subr.mxu0 %v2548_v3 }
  0xc4   :  { %v2620_v8 = vpop.f32.mrf.mxu0 }
  0xc5   :  { %v147_v48 = vadd.f32 %v2620_v8, %v2625_v9 }
  0xc6   :  { %v141_v10 = vpop.f32.mrf.mxu0 }
  0xc7   :  { %v142_v11 = vadd.f32 %v2625_v9, %v141_v10 }
  0xc8   :  { %v2747_v42 = vpop.f32.mrf.mxu0 }
  0xc9   :  { %v180_v12 = vmax.f32 %v142_v11, 0.0 }
  0xca   :  { %v151_v43 = vpop.f32.mrf.mxu0 }
  0xcb   :  { %2255 = vmatmul.mubr.msk.f32.vlgmr.msra.gmra.mxu1 %vm187_vm3, %v180_v12  ;;  %v181_v33 = vmul.f32 0.0, %v180_v12  ;;  %v152_v10 = vadd.f32 %v2625_v9, %v151_v43 }
  0xcc   :  { %2258 = vmatpush3.msra.mxu1 %v2631_v13  ;;  %2265 = vmatprep.mubr.msk.f32.mxu1 %vm2549_vm2, %v2548_v3  ;;  %v2749_v44 = vpop.f32.mrf.mxu0 }
  0xcd   :  { %2259 = vmatprep.subr.mxu1 %v2548_v3  ;;  %2514 = vtanh.f32 %v181_v33 }
  0xce   :  { %2260 = vmatpush3.msra.mxu1 %v2641_v14  ;;  %v2751_v45 = vpop.f32.mrf.mxu0 }
  0xcf   :  { %2261 = vmatprep.subr.mxu1 %v2548_v3 }
  0xd0   :  { %2262 = vmatpush3.msra.mxu1 %v2648_v15  ;;  %v2753_v46 = vpop.f32.mrf.mxu0 }
  0xd1   :  { %2263 = vmatprep.subr.mxu1 %v2548_v3 }
  0xd2   :  { %2264 = vmatpush3.msra.mxu1 %v2655_v16  ;;  %v2755_v47 = vpop.f32.mrf.mxu0 }
  0xd3   :  { %2279 = vmatprep.subr.mxu1 %v2548_v3 }
  0xda   :  { %v2515_v38 = vpop.eup %2514 }
 0x18b   :  { %v257_v18 = vpop.f32.mrf.mxu1 }
 0x18c   :  { %v258_v19 = vadd.f32 %v2662_v17, %v257_v18 }
 0x18d   :  { %v2256_v20 = vpop.f32.mrf.mxu1 }
 0x18e   :  { %v261_v21 = vmax.f32 %v258_v19, 0.0 }
 0x190   :  { %2266 = vmatmul.mubr.msk.f32.vlgmr.msra.gmra.mxu1 %vm187_vm3, %v261_v21 }
 0x191   :  { %2280 = vmatpush3.msra.mxu1 %v2593_v4  ;;  %2287 = vmatprep.mubr.msk.f32.mxu1 %vm2549_vm2, %v2548_v3 }
 0x192   :  { %2281 = vmatprep.subr.mxu1 %v2548_v3 }
 0x193   :  { %2282 = vmatpush3.msra.mxu1 %v2600_v5 }
 0x194   :  { %2283 = vmatprep.subr.mxu1 %v2548_v3 }
 0x195   :  { %2284 = vmatpush3.msra.mxu1 %v2607_v6 }
 0x196   :  { %2285 = vmatprep.subr.mxu1 %v2548_v3 }
 0x197   :  { %2286 = vmatpush3.msra.mxu1 %v2614_v7 }
 0x198   :  { %2301 = vmatprep.subr.mxu1 %v2548_v3 }
 0x250   :  { %v335_v34 = vpop.f32.mrf.mxu1 }
 0x251   :  { %v336_v35 = vadd.f32 %v2733_v32, %v335_v34 }
 0x252   :  { %v2267_v36 = vpop.f32.mrf.mxu1 }
 0x253   :  { %v339_v37 = vmax.f32 %v336_v35, 0.0 }
 0x255   :  { %2516 = vtanh.f32 %v339_v37 }
 0x262   :  { %v2517_v39 = vpop.eup %2516 }
 0x263   :  { %v341_v40 = vadd.f32 %v2517_v39, %v2515_v38  ;;  %v157_v39 = vadd.f32 %v2747_v42, %v2625_v9 }
 0x265   :  { %v342_v41 = vmul.f32 %v341_v40, %v339_v37 }
 0x267   :  { %2277 = vmatmul.mubr.msk.f32.vlgmr.msra.gmra.mxu0 %vm187_vm3, %v342_v41 }
 0x268   :  { %2291 = vmatpush3.msra.mxu0 %v2631_v13  ;;  %2298 = vmatprep.mubr.msk.f32.mxu0 %vm2549_vm2, %v2548_v3 }
 0x269   :  { %2292 = vmatprep.subr.mxu0 %v2548_v3 }
 0x26a   :  { %2293 = vmatpush3.msra.mxu0 %v2641_v14 }
 0x26b   :  { %2294 = vmatprep.subr.mxu0 %v2548_v3 }
 0x26c   :  { %2295 = vmatpush3.msra.mxu0 %v2648_v15 }
 0x26d   :  { %2296 = vmatprep.subr.mxu0 %v2548_v3 }
 0x26e   :  { %2297 = vmatpush3.msra.mxu0 %v2655_v16 }
 0x26f   :  { %2312 = vmatprep.subr.mxu0 %v2548_v3 }
 0x327   :  { %v412_v50 = vpop.f32.mrf.mxu0 }
 0x328   :  { %v416_v51 = vadd.f32 %v412_v50, %v147_v48 }
 0x329   :  { %v2278_v52 = vpop.f32.mrf.mxu0 }
 0x32a   :  { %v421_v53 = vadd.f32 %v2762_v49, %v416_v51 }
 0x32c   :  { %v422_v54 = vmax.f32 %v421_v53, 0.0 }
 0x32e   :  { %2288 = vmatmul.mubr.msk.f32.vlgmr.msra.gmra.mxu1 %vm187_vm3, %v422_v54  ;;  %v423_v59 = vmul.f32 %v422_v54, %v341_v40 }
 0x32f   :  { %2302 = vmatpush3.msra.mxu1 %v2695_v26  ;;  %2309 = vmatprep.mubr.msk.f32.mxu1 %vm2549_vm2, %v2548_v3 }
 0x330   :  { %2303 = vmatprep.subr.mxu1 %v2548_v3  ;;  %2518 = vtanh.f32 %v423_v59 }
 0x331   :  { %2304 = vmatpush3.msra.mxu1 %v2709_v29 }
 0x332   :  { %2305 = vmatprep.subr.mxu1 %v2548_v3 }
 0x333   :  { %2306 = vmatpush3.msra.mxu1 %v2719_v30 }
 0x334   :  { %2307 = vmatprep.subr.mxu1 %v2548_v3 }
 0x335   :  { %2308 = vmatpush3.msra.mxu1 %v2726_v31 }
 0x336   :  { %2323 = vmatprep.subr.mxu1 %v2548_v3 }
 0x33d   :  { %v2519_v0 = vpop.eup %2518 }
 0x3ee   :  { %v494_v55 = vpop.f32.mrf.mxu1 }
 0x3ef   :  { %v495_v56 = vadd.f32 %v2662_v17, %v494_v55 }
 0x3f0   :  { %v2289_v57 = vpop.f32.mrf.mxu1 }
 0x3f1   :  { %v498_v58 = vmax.f32 %v495_v56, 0.0 }
 0x3f3   :  { %2299 = vmatmul.mubr.msk.f32.vlgmr.msra.gmra.mxu0 %vm187_vm3, %v498_v58 }
 0x3f4   :  { %2313 = vmatpush3.msra.mxu0 %v2593_v4  ;;  %2320 = vmatprep.mubr.msk.f32.mxu0 %vm2549_vm2, %v2548_v3 }
 0x3f5   :  { %2314 = vmatprep.subr.mxu0 %v2548_v3 }
 0x3f6   :  { %2315 = vmatpush3.msra.mxu0 %v2600_v5 }
 0x3f7   :  { %2316 = vmatprep.subr.mxu0 %v2548_v3 }
 0x3f8   :  { %2317 = vmatpush3.msra.mxu0 %v2607_v6 }
 0x3f9   :  { %2318 = vmatprep.subr.mxu0 %v2548_v3 }
 0x3fa   :  { %2319 = vmatpush3.msra.mxu0 %v2614_v7 }
 0x3fb   :  { %2334 = vmatprep.subr.mxu0 %v2548_v3 }
 0x4b3   :  { %v568_v60 = vpop.f32.mrf.mxu0 }
 0x4b4   :  { %v569_v61 = vadd.f32 %v2733_v32, %v568_v60 }
 0x4b5   :  { %v2300_v62 = vpop.f32.mrf.mxu0 }
 0x4b6   :  { %v572_v63 = vmax.f32 %v569_v61, 0.0 }
 0x4b8   :  { %2520 = vtanh.f32 %v572_v63 }
 0x4c5   :  { %v2521_v1 = vpop.eup %2520 }
 0x4c6   :  { %v574_v2 = vadd.f32 %v2521_v1, %v2519_v0 }
 0x4c8   :  { %v575_v8 = vmul.f32 %v574_v2, %v572_v63  ;;  %v162_v63 = vadd.f32 %v2625_v9, %v2751_v45 }
 0x4ca   :  { %2310 = vmatmul.mubr.msk.f32.vlgmr.msra.gmra.mxu1 %vm187_vm3, %v575_v8 }
 0x4cb   :  { %2324 = vmatpush3.msra.mxu1 %v2631_v13  ;;  %2331 = vmatprep.mubr.msk.f32.mxu1 %vm2549_vm2, %v2548_v3 }
 0x4cc   :  { %2325 = vmatprep.subr.mxu1 %v2548_v3 }
 0x4cd   :  { %2326 = vmatpush3.msra.mxu1 %v2641_v14 }
 0x4ce   :  { %2327 = vmatprep.subr.mxu1 %v2548_v3 }
 0x4cf   :  { %2328 = vmatpush3.msra.mxu1 %v2648_v15 }
 0x4d0   :  { %2329 = vmatprep.subr.mxu1 %v2548_v3 }
 0x4d1   :  { %2330 = vmatpush3.msra.mxu1 %v2655_v16 }
 0x4d2   :  { %2345 = vmatprep.subr.mxu1 %v2548_v3 }
 0x58a   :  { %v645_v11 = vpop.f32.mrf.mxu1 }
 0x58b   :  { %v649_v12 = vadd.f32 %v645_v11, %v152_v10 }
 0x58c   :  { %v2311_v18 = vpop.f32.mrf.mxu1 }
 0x58d   :  { %v650_v19 = vadd.f32 %v2762_v49, %v649_v12 }
 0x58f   :  { %v651_v20 = vmax.f32 %v650_v19, 0.0 }
 0x591   :  { %2321 = vmatmul.mubr.msk.f32.vlgmr.msra.gmra.mxu0 %vm187_vm3, %v651_v20  ;;  %v652_v25 = vmul.f32 %v651_v20, %v574_v2 }
 0x592   :  { %2335 = vmatpush3.msra.mxu0 %v2695_v26  ;;  %2342 = vmatprep.mubr.msk.f32.mxu0 %vm2549_vm2, %v2548_v3 }
 0x593   :  { %2336 = vmatprep.subr.mxu0 %v2548_v3  ;;  %2522 = vtanh.f32 %v652_v25 }
 0x594   :  { %2337 = vmatpush3.msra.mxu0 %v2709_v29 }
 0x595   :  { %2338 = vmatprep.subr.mxu0 %v2548_v3 }
 0x596   :  { %2339 = vmatpush3.msra.mxu0 %v2719_v30 }
 0x597   :  { %2340 = vmatprep.subr.mxu0 %v2548_v3 }
 0x598   :  { %2341 = vmatpush3.msra.mxu0 %v2726_v31 }
 0x599   :  { %2356 = vmatprep.subr.mxu0 %v2548_v3 }
 0x5a0   :  { %v2523_v35 = vpop.eup %2522 }
 0x651   :  { %v723_v21 = vpop.f32.mrf.mxu0 }
 0x652   :  { %v724_v22 = vadd.f32 %v2662_v17, %v723_v21 }
 0x653   :  { %v2322_v23 = vpop.f32.mrf.mxu0 }
 0x654   :  { %v727_v24 = vmax.f32 %v724_v22, 0.0 }
 0x656   :  { %2332 = vmatmul.mubr.msk.f32.vlgmr.msra.gmra.mxu1 %vm187_vm3, %v727_v24 }
 0x657   :  { %2346 = vmatpush3.msra.mxu1 %v2593_v4  ;;  %2353 = vmatprep.mubr.msk.f32.mxu1 %vm2549_vm2, %v2548_v3 }
 0x658   :  { %2347 = vmatprep.subr.mxu1 %v2548_v3 }
 0x659   :  { %2348 = vmatpush3.msra.mxu1 %v2600_v5 }
 0x65a   :  { %2349 = vmatprep.subr.mxu1 %v2548_v3 }
 0x65b   :  { %2350 = vmatpush3.msra.mxu1 %v2607_v6 }
 0x65c   :  { %2351 = vmatprep.subr.mxu1 %v2548_v3 }
 0x65d   :  { %2352 = vmatpush3.msra.mxu1 %v2614_v7 }
 0x65e   :  { %2367 = vmatprep.subr.mxu1 %v2548_v3 }
 0x716   :  { %v797_v27 = vpop.f32.mrf.mxu1 }
 0x717   :  { %v798_v28 = vadd.f32 %v2733_v32, %v797_v27 }
 0x718   :  { %v2333_v33 = vpop.f32.mrf.mxu1 }
 0x719   :  { %v801_v34 = vmax.f32 %v798_v28, 0.0  ;;  %v167_v33 = vadd.f32 %v2749_v44, %v2625_v9 }
 0x71b   :  { %2524 = vtanh.f32 %v801_v34 }
 0x728   :  { %v2525_v36 = vpop.eup %2524 }
 0x729   :  { %v803_v37 = vadd.f32 %v2525_v36, %v2523_v35 }
 0x72b   :  { %v804_v38 = vmul.f32 %v803_v37, %v801_v34 }
 0x72d   :  { %2343 = vmatmul.mubr.msk.f32.vlgmr.msra.gmra.mxu0 %vm187_vm3, %v804_v38 }
 0x72e   :  { %2357 = vmatpush3.msra.mxu0 %v2631_v13  ;;  %2364 = vmatprep.mubr.msk.f32.mxu0 %vm2549_vm2, %v2548_v3 }
 0x72f   :  { %2358 = vmatprep.subr.mxu0 %v2548_v3 }
 0x730   :  { %2359 = vmatpush3.msra.mxu0 %v2641_v14 }
 0x731   :  { %2360 = vmatprep.subr.mxu0 %v2548_v3 }
 0x732   :  { %2361 = vmatpush3.msra.mxu0 %v2648_v15 }
 0x733   :  { %2362 = vmatprep.subr.mxu0 %v2548_v3 }
 0x734   :  { %2363 = vmatpush3.msra.mxu0 %v2655_v16 }
 0x735   :  { %2378 = vmatprep.subr.mxu0 %v2548_v3 }
 0x7ed   :  { %v874_v40 = vpop.f32.mrf.mxu0 }
 0x7ee   :  { %v878_v41 = vadd.f32 %v874_v40, %v157_v39 }
 0x7ef   :  { %v2344_v43 = vpop.f32.mrf.mxu0 }
 0x7f0   :  { %v879_v48 = vadd.f32 %v2762_v49, %v878_v41 }
 0x7f2   :  { %v880_v50 = vmax.f32 %v879_v48, 0.0 }
 0x7f4   :  { %2354 = vmatmul.mubr.msk.f32.vlgmr.msra.gmra.mxu1 %vm187_vm3, %v880_v50  ;;  %v881_v54 = vmul.f32 %v880_v50, %v803_v37 }
 0x7f5   :  { %2368 = vmatpush3.msra.mxu1 %v2695_v26  ;;  %2375 = vmatprep.mubr.msk.f32.mxu1 %vm2549_vm2, %v2548_v3 }
 0x7f6   :  { %2369 = vmatprep.subr.mxu1 %v2548_v3  ;;  %2526 = vtanh.f32 %v881_v54 }
 0x7f7   :  { %2370 = vmatpush3.msra.mxu1 %v2709_v29 }
 0x7f8   :  { %2371 = vmatprep.subr.mxu1 %v2548_v3 }
 0x7f9   :  { %2372 = vmatpush3.msra.mxu1 %v2719_v30 }
 0x7fa   :  { %2373 = vmatprep.subr.mxu1 %v2548_v3 }
 0x7fb   :  { %2374 = vmatpush3.msra.mxu1 %v2726_v31 }
 0x7fc   :  { %2389 = vmatprep.subr.mxu1 %v2548_v3 }
 0x803   :  { %v2527_v59 = vpop.eup %2526 }
 0x8b4   :  { %v952_v42 = vpop.f32.mrf.mxu1 }
 0x8b5   :  { %v953_v51 = vadd.f32 %v2662_v17, %v952_v42 }
 0x8b6   :  { %v2355_v52 = vpop.f32.mrf.mxu1 }
 0x8b7   :  { %v956_v53 = vmax.f32 %v953_v51, 0.0 }
 0x8b9   :  { %2365 = vmatmul.mubr.msk.f32.vlgmr.msra.gmra.mxu0 %vm187_vm3, %v956_v53 }
 0x8ba   :  { %2379 = vmatpush3.msra.mxu0 %v2593_v4  ;;  %2386 = vmatprep.mubr.msk.f32.mxu0 %vm2549_vm2, %v2548_v3 }
 0x8bb   :  { %2380 = vmatprep.subr.mxu0 %v2548_v3 }
 0x8bc   :  { %2381 = vmatpush3.msra.mxu0 %v2600_v5 }
 0x8bd   :  { %2382 = vmatprep.subr.mxu0 %v2548_v3 }
 0x8be   :  { %2383 = vmatpush3.msra.mxu0 %v2607_v6 }
 0x8bf   :  { %2384 = vmatprep.subr.mxu0 %v2548_v3 }
 0x8c0   :  { %2385 = vmatpush3.msra.mxu0 %v2614_v7 }
 0x8c1   :  { %2400 = vmatprep.subr.mxu0 %v2548_v3 }
 0x979   :  { %v1026_v55 = vpop.f32.mrf.mxu0 }
 0x97a   :  { %v1027_v56 = vadd.f32 %v2733_v32, %v1026_v55 }
 0x97b   :  { %v2366_v57 = vpop.f32.mrf.mxu0 }
 0x97c   :  { %v1030_v58 = vmax.f32 %v1027_v56, 0.0  ;;  %v172_v56 = vadd.f32 %v2625_v9, %v2755_v47 }
 0x97e   :  { %2528 = vtanh.f32 %v1030_v58 }
 0x98b   :  { %v2529_v60 = vpop.eup %2528 }
 0x98c   :  { %v1032_v61 = vadd.f32 %v2529_v60, %v2527_v59 }
 0x98e   :  { %v1033_v62 = vmul.f32 %v1032_v61, %v1030_v58 }
 0x990   :  { %2376 = vmatmul.mubr.msk.f32.vlgmr.msra.gmra.mxu1 %vm187_vm3, %v1033_v62 }
 0x991   :  { %2390 = vmatpush3.msra.mxu1 %v2631_v13  ;;  %2397 = vmatprep.mubr.msk.f32.mxu1 %vm2549_vm2, %v2548_v3 }
 0x992   :  { %2391 = vmatprep.subr.mxu1 %v2548_v3 }
 0x993   :  { %2392 = vmatpush3.msra.mxu1 %v2641_v14 }
 0x994   :  { %2393 = vmatprep.subr.mxu1 %v2548_v3 }
 0x995   :  { %2394 = vmatpush3.msra.mxu1 %v2648_v15 }
 0x996   :  { %2395 = vmatprep.subr.mxu1 %v2548_v3 }
 0x997   :  { %2396 = vmatpush3.msra.mxu1 %v2655_v16 }
 0x998   :  { %2411 = vmatprep.subr.mxu1 %v2548_v3 }
 0xa50   :  { %v1103_v0 = vpop.f32.mrf.mxu1 }
 0xa51   :  { %v1107_v1 = vadd.f32 %v1103_v0, %v162_v63 }
 0xa52   :  { %v2377_v2 = vpop.f32.mrf.mxu1 }
 0xa53   :  { %v1108_v8 = vadd.f32 %v2762_v49, %v1107_v1 }
 0xa55   :  { %v1109_v10 = vmax.f32 %v1108_v8, 0.0 }
 0xa57   :  { %2387 = vmatmul.mubr.msk.f32.vlgmr.msra.gmra.mxu0 %vm187_vm3, %v1109_v10  ;;  %v1110_v19 = vmul.f32 %v1109_v10, %v1032_v61 }
 0xa58   :  { %2401 = vmatpush3.msra.mxu0 %v2695_v26  ;;  %2408 = vmatprep.mubr.msk.f32.mxu0 %vm2549_vm2, %v2548_v3 }
 0xa59   :  { %2402 = vmatprep.subr.mxu0 %v2548_v3  ;;  %2530 = vtanh.f32 %v1110_v19 }
 0xa5a   :  { %2403 = vmatpush3.msra.mxu0 %v2709_v29 }
 0xa5b   :  { %2404 = vmatprep.subr.mxu0 %v2548_v3 }
 0xa5c   :  { %2405 = vmatpush3.msra.mxu0 %v2719_v30 }
 0xa5d   :  { %2406 = vmatprep.subr.mxu0 %v2548_v3 }
 0xa5e   :  { %2407 = vmatpush3.msra.mxu0 %v2726_v31 }
 0xa5f   :  { %2422 = vmatprep.subr.mxu0 %v2548_v3 }
 0xa66   :  { %v2531_v24 = vpop.eup %2530 }
 0xb17   :  { %v1181_v45 = vpop.f32.mrf.mxu0 }
 0xb18   :  { %v1182_v11 = vadd.f32 %v2662_v17, %v1181_v45 }
 0xb19   :  { %v2388_v12 = vpop.f32.mrf.mxu0 }
 0xb1a   :  { %v1185_v18 = vmax.f32 %v1182_v11, 0.0 }
 0xb1c   :  { %2398 = vmatmul.mubr.msk.f32.vlgmr.msra.gmra.mxu1 %vm187_vm3, %v1185_v18 }
 0xb1d   :  { %2412 = vmatpush3.msra.mxu1 %v2593_v4  ;;  %2419 = vmatprep.mubr.msk.f32.mxu1 %vm2549_vm2, %v2548_v3 }
 0xb1e   :  { %2413 = vmatprep.subr.mxu1 %v2548_v3 }
 0xb1f   :  { %2414 = vmatpush3.msra.mxu1 %v2600_v5 }
 0xb20   :  { %2415 = vmatprep.subr.mxu1 %v2548_v3 }
 0xb21   :  { %2416 = vmatpush3.msra.mxu1 %v2607_v6 }
 0xb22   :  { %2417 = vmatprep.subr.mxu1 %v2548_v3 }
 0xb23   :  { %2418 = vmatpush3.msra.mxu1 %v2614_v7 }
 0xb24   :  { %2433 = vmatprep.subr.mxu1 %v2548_v3 }
 0xbdc   :  { %v1255_v20 = vpop.f32.mrf.mxu1 }
 0xbdd   :  { %v1256_v21 = vadd.f32 %v2733_v32, %v1255_v20 }
 0xbde   :  { %v2399_v22 = vpop.f32.mrf.mxu1 }
 0xbdf   :  { %v1259_v23 = vmax.f32 %v1256_v21, 0.0 }
 0xbe1   :  { %2532 = vtanh.f32 %v1259_v23 }
 0xbee   :  { %v2533_v25 = vpop.eup %2532 }
 0xbef   :  { %v1261_v27 = vadd.f32 %v2533_v25, %v2531_v24 }
 0xbf1   :  { %v1262_v28 = vmul.f32 %v1261_v27, %v1259_v23 }
 0xbf3   :  { %2409 = vmatmul.mubr.msk.f32.vlgmr.msra.gmra.mxu0 %vm187_vm3, %v1262_v28  ;;  %v2101_v28 = vld [vmem:[%s3024_s3 + $0x20] ss:$0 sm:$0xff] }
 0xbf4   :  { %2423 = vmatpush3.msra.mxu0 %v2631_v13  ;;  %2430 = vmatprep.mubr.msk.f32.mxu0 %vm2549_vm2, %v2548_v3 }
 0xbf5   :  { %2424 = vmatprep.subr.mxu0 %v2548_v3 }
 0xbf6   :  { %2425 = vmatpush3.msra.mxu0 %v2641_v14 }
 0xbf7   :  { %2426 = vmatprep.subr.mxu0 %v2548_v3 }
 0xbf8   :  { %2427 = vmatpush3.msra.mxu0 %v2648_v15 }
 0xbf9   :  { %2428 = vmatprep.subr.mxu0 %v2548_v3 }
 0xbfa   :  { %2429 = vmatpush3.msra.mxu0 %v2655_v16 }
 0xbfb   :  { %2444 = vmatprep.subr.mxu0 %v2548_v3 }
 0xcb3   :  { %v1332_v34 = vpop.f32.mrf.mxu0 }
 0xcb4   :  { %v1336_v35 = vadd.f32 %v1332_v34, %v167_v33 }
 0xcb5   :  { %v2410_v36 = vpop.f32.mrf.mxu0 }
 0xcb6   :  { %v1337_v37 = vadd.f32 %v2762_v49, %v1336_v35 }
 0xcb8   :  { %v1338_v38 = vmax.f32 %v1337_v37, 0.0 }
 0xcba   :  { %2420 = vmatmul.mubr.msk.f32.vlgmr.msra.gmra.mxu1 %vm187_vm3, %v1338_v38  ;;  %v1339_v43 = vmul.f32 %v1338_v38, %v1261_v27 }
 0xcbb   :  { %2434 = vmatpush3.msra.mxu1 %v2695_v26  ;;  %2441 = vmatprep.mubr.msk.f32.mxu1 %vm2549_vm2, %v2548_v3 }
 0xcbc   :  { %2435 = vmatprep.subr.mxu1 %v2548_v3  ;;  %2534 = vtanh.f32 %v1339_v43 }
 0xcbd   :  { %2436 = vmatpush3.msra.mxu1 %v2709_v29 }
 0xcbe   :  { %2437 = vmatprep.subr.mxu1 %v2548_v3 }
 0xcbf   :  { %2438 = vmatpush3.msra.mxu1 %v2719_v30 }
 0xcc0   :  { %2439 = vmatprep.subr.mxu1 %v2548_v3 }
 0xcc1   :  { %2440 = vmatpush3.msra.mxu1 %v2726_v31 }
 0xcc2   :  { %2455 = vmatprep.subr.mxu1 %v2548_v3 }
 0xcc9   :  { %v2535_v52 = vpop.eup %2534 }
 0xd7a   :  { %v1410_v44 = vpop.f32.mrf.mxu1 }
 0xd7b   :  { %v1411_v39 = vadd.f32 %v2662_v17, %v1410_v44 }
 0xd7c   :  { %v2421_v40 = vpop.f32.mrf.mxu1 }
 0xd7d   :  { %v1414_v41 = vmax.f32 %v1411_v39, 0.0 }
 0xd7f   :  { %2431 = vmatmul.mubr.msk.f32.vlgmr.msra.gmra.mxu0 %vm187_vm3, %v1414_v41 }
 0xd80   :  { %2445 = vmatpush3.msra.mxu0 %v2593_v4  ;;  %2452 = vmatprep.mubr.msk.f32.mxu0 %vm2549_vm2, %v2548_v3 }
 0xd81   :  { %2446 = vmatprep.subr.mxu0 %v2548_v3 }
 0xd82   :  { %2447 = vmatpush3.msra.mxu0 %v2600_v5 }
 0xd83   :  { %2448 = vmatprep.subr.mxu0 %v2548_v3 }
 0xd84   :  { %2449 = vmatpush3.msra.mxu0 %v2607_v6 }
 0xd85   :  { %2450 = vmatprep.subr.mxu0 %v2548_v3 }
 0xd86   :  { %2451 = vmatpush3.msra.mxu0 %v2614_v7 }
 0xd87   :  { %2466 = vmatprep.subr.mxu0 %v2548_v3 }
 0xe3f   :  { %v1484_v48 = vpop.f32.mrf.mxu0 }
 0xe40   :  { %v1485_v50 = vadd.f32 %v2733_v32, %v1484_v48 }
 0xe41   :  { %v2432_v42 = vpop.f32.mrf.mxu0 }
 0xe42   :  { %v1488_v51 = vmax.f32 %v1485_v50, 0.0 }
 0xe44   :  { %2536 = vtanh.f32 %v1488_v51 }
 0xe51   :  { %v2537_v53 = vpop.eup %2536 }
 0xe52   :  { %v1490_v54 = vadd.f32 %v2537_v53, %v2535_v52 }
 0xe54   :  { %v1491_v55 = vmul.f32 %v1490_v54, %v1488_v51 }
 0xe56   :  { %2442 = vmatmul.mubr.msk.f32.vlgmr.msra.gmra.mxu1 %vm187_vm3, %v1491_v55 }
 0xe57   :  { %2456 = vmatpush3.msra.mxu1 %v2631_v13  ;;  %2463 = vmatprep.mubr.msk.f32.mxu1 %vm2549_vm2, %v2548_v3 }
 0xe58   :  { %2457 = vmatprep.subr.mxu1 %v2548_v3 }
 0xe59   :  { %2458 = vmatpush3.msra.mxu1 %v2641_v14 }
 0xe5a   :  { %2459 = vmatprep.subr.mxu1 %v2548_v3 }
 0xe5b   :  { %2460 = vmatpush3.msra.mxu1 %v2648_v15 }
 0xe5c   :  { %2461 = vmatprep.subr.mxu1 %v2548_v3 }
 0xe5d   :  { %2462 = vmatpush3.msra.mxu1 %v2655_v16 }
 0xe5e   :  { %2477 = vmatprep.subr.mxu1 %v2548_v3 }
 0xf16   :  { %v1561_v57 = vpop.f32.mrf.mxu1 }
 0xf17   :  { %v1565_v58 = vadd.f32 %v1561_v57, %v172_v56 }
 0xf18   :  { %v2443_v59 = vpop.f32.mrf.mxu1 }
 0xf19   :  { %v1566_v60 = vadd.f32 %v2762_v49, %v1565_v58 }
 0xf1b   :  { %v1567_v61 = vmax.f32 %v1566_v60, 0.0 }
 0xf1d   :  { %2453 = vmatmul.mubr.msk.f32.vlgmr.msra.gmra.mxu0 %vm187_vm3, %v1567_v61 }
 0xf1e   :  { %2467 = vmatpush3.msra.mxu0 %v2695_v26  ;;  %2474 = vmatprep.mubr.msk.f32.mxu0 %vm2549_vm2, %v2548_v3 }
 0xf1f   :  { %2468 = vmatprep.subr.mxu0 %v2548_v3 }
 0xf20   :  { %2469 = vmatpush3.msra.mxu0 %v2709_v29  ;;  %v1568_v29 = vmul.f32 %v1567_v61, %v1490_v54 }
 0xf21   :  { %2470 = vmatprep.subr.mxu0 %v2548_v3 }
 0xf22   :  { %2471 = vmatpush3.msra.mxu0 %v2719_v30  ;;  %2538 = vtanh.f32 %v1568_v29 }
 0xf23   :  { %2472 = vmatprep.subr.mxu0 %v2548_v3 }
 0xf24   :  { %2473 = vmatpush3.msra.mxu0 %v2726_v31 }
 0xf25   :  { %2488 = vmatprep.subr.mxu0 %v2548_v3 }
 0xf2f   :  { %v2539_v1 = vpop.eup %2538 }
 0xfdd   :  { %v1639_v47 = vpop.f32.mrf.mxu0 }
 0xfde   :  { %v1640_v26 = vadd.f32 %v2662_v17, %v1639_v47 }
 0xfdf   :  { %v2454_v62 = vpop.f32.mrf.mxu0 }
 0xfe0   :  { %v1643_v63 = vmax.f32 %v1640_v26, 0.0 }
 0xfe2   :  { %2464 = vmatmul.mubr.msk.f32.vlgmr.msra.gmra.mxu1 %vm187_vm3, %v1643_v63 }
 0xfe3   :  { %2478 = vmatpush3.msra.mxu1 %v2593_v4  ;;  %2485 = vmatprep.mubr.msk.f32.mxu1 %vm2549_vm2, %v2548_v3 }
 0xfe4   :  { %2479 = vmatprep.subr.mxu1 %v2548_v3 }
 0xfe5   :  { %2480 = vmatpush3.msra.mxu1 %v2600_v5 }
 0xfe6   :  { %2481 = vmatprep.subr.mxu1 %v2548_v3 }
 0xfe7   :  { %2482 = vmatpush3.msra.mxu1 %v2607_v6  ;;  %v177_v6 = vadd.f32 %v2753_v46, %v2625_v9  ;;  %v1953_v9 = vld [vmem:[%s3024_s3 + $0x18] sm:$0xff]  ;;  %v1950_v46 = vld [vmem:[%s3024_s3] sm:$0xff] }
 0xfe8   :  { %2483 = vmatprep.subr.mxu1 %v2548_v3 }
 0xfe9   :  { %2484 = vmatpush3.msra.mxu1 %v2614_v7 }
 0xfea   :  { %2499 = vmatprep.subr.mxu1 %v2548_v3 }
0x10a2   :  { %v1713_v30 = vpop.f32.mrf.mxu1 }
0x10a3   :  { %v1714_v4 = vadd.f32 %v2733_v32, %v1713_v30 }
0x10a4   :  { %v2465_v31 = vpop.f32.mrf.mxu1 }
0x10a5   :  { %v1717_v0 = vmax.f32 %v1714_v4, 0.0 }
0x10a7   :  { %2540 = vtanh.f32 %v1717_v0 }
0x10b4   :  { %v2541_v5 = vpop.eup %2540 }
0x10b5   :  { %v1719_v2 = vadd.f32 %v2541_v5, %v2539_v1 }
0x10b7   :  { %v1720_v8 = vmul.f32 %v1719_v2, %v1717_v0 }
0x10b9   :  { %2475 = vmatmul.mubr.msk.f32.vlgmr.msra.gmra.mxu0 %vm187_vm3, %v1720_v8 }
0x10ba   :  { %2489 = vmatpush3.msra.mxu0 %v2631_v13  ;;  %2496 = vmatprep.mubr.msk.f32.mxu0 %vm2549_vm2, %v2548_v3 }
0x10bb   :  { %2490 = vmatprep.subr.mxu0 %v2548_v3 }
0x10bc   :  { %2491 = vmatpush3.msra.mxu0 %v2641_v14 }
0x10bd   :  { %2492 = vmatprep.subr.mxu0 %v2548_v3 }
0x10be   :  { %2493 = vmatpush3.msra.mxu0 %v2648_v15 }
0x10bf   :  { %2494 = vmatprep.subr.mxu0 %v2548_v3 }
0x10c0   :  { %2495 = vmatpush3.msra.mxu0 %v2655_v16  ;;  %v1952_v16 = vld [vmem:[%s3024_s3 + $0x10] sm:$0xff] }
0x1179   :  { %v1790_v7 = vpop.f32.mrf.mxu0 }
0x117a   :  { %v1794_v13 = vadd.f32 %v1790_v7, %v177_v6 }
0x117b   :  { %v2476_v10 = vpop.f32.mrf.mxu0 }
0x117c   :  { %v1795_v45 = vadd.f32 %v2762_v49, %v1794_v13  ;;  %v2036_v49 = vld [vmem:[%s3025_s1] sm:$0xff]  ;;  %s2551_s1 = smov 120  }
0x117d   :  { %2038 = vrot.lane.b32.xlu0 %v2036_v49, %s2550_s21 }
0x117e   :  { %v1796_v11 = vmax.f32 %v1795_v45, 0.0 }
0x1180   :  { %2486 = vmatmul.mubr.msk.f32.vlgmr.msra.gmra.mxu1 %vm187_vm3, %v1796_v11  ;;  %v1797_v19 = vmul.f32 %v1796_v11, %v1719_v2 }
0x1181   :  { %2507 = vmatprep.mubr.msk.f32.mxu1 %vm2549_vm2, %v2548_v3  ;;  %2500 = vmatpush3.msra.mxu1 %v1953_v9 }
0x1182   :  { %2501 = vmatprep.subr.mxu1 %v2548_v3  ;;  %2542 = vtanh.f32 %v1797_v19 }
0x1183   :  { %2502 = vmatpush3.msra.mxu1 %v1952_v16 }
0x1184   :  { %2503 = vmatprep.subr.mxu1 %v2548_v3 }
0x11ef   :  { %v2039_v38 = vpop.permute.xlu0 %2038 }
0x1240   :  { %v1868_v14 = vpop.f32.mrf.mxu1 }
0x1241   :  { %v1869_v15 = vadd.f32 %v2662_v17, %v1868_v14  ;;  %v1951_v17 = vld [vmem:[%s3024_s3 + $0x8] sm:$0xff] }
0x1242   :  { %v2487_v12 = vpop.f32.mrf.mxu1  ;;  %2504 = vmatpush3.msra.mxu1 %v1951_v17 }
0x1243   :  { %v1872_v18 = vmax.f32 %v1869_v15, 0.0  ;;  %2505 = vmatprep.subr.mxu1 %v2548_v3  ;;  %v2543_v3 = vpop.eup %2542 }
0x1244   :  { %2506 = vmatpush3.msra.mxu1 %v1950_v46 }
0x1245   :  { %2497 = vmatmul.mubr.msk.f32.vlgmr.msra.gmra.mxu0 %vm187_vm3, %v1872_v18 }
0x1305   :  { %v1942_v20 = vpop.f32.mrf.mxu0 }
0x1306   :  { %v1943_v21 = vadd.f32 %v2733_v32, %v1942_v20 }
0x1307   :  { %v2498_v22 = vpop.f32.mrf.mxu0 }
0x1308   :  { %v1946_v23 = vmax.f32 %v1943_v21, 0.0 }
0x130a   :  { %2544 = vtanh.f32 %v1946_v23 }
0x1317   :  { %v2545_v24 = vpop.eup %2544 }
0x1318   :  { %v1948_v25 = vadd.f32 %v2545_v24, %v2543_v3 }
0x131a   :  { %v1949_v27 = vmul.f32 %v1948_v25, %v1946_v23 }
0x131c   :  { %2508 = vmatmul.mubr.msk.f32.vlgmr.msra.gmra.mxu1 %vm187_vm3, %v1949_v27 }
0x13dc   :  { %v2028_v33 = vpop.f32.mrf.mxu1 }
0x13dd   :  { %v2029_v34 = vadd.f32 %v2101_v28, %v2028_v33 }
0x13de   :  { %v2509_v35 = vpop.f32.mrf.mxu1 }
0x13df   :  { %v2032_v36 = vmax.f32 %v2029_v34, -20.0  ;;  %2048 = vrot.lane.b32.xlu1 %v2029_v34, %s2550_s21 }
0x13e1   :  { %v2033_v32 = vmin.f32 %v2032_v36, 2.0 }
0x13e3   :  { %v2034_v37 = vmul.f32 1.442695, %v2033_v32 }
0x13e5   :  { %2546 = vpow2.f32 %v2034_v37 }
0x13f2   :  { %v2547_v44 = vpop.eup %2546 }
0x13f3   :  { %v2041_v39 = vmul.f32 %v2547_v44, %v2039_v38  ;;  %2052 = vrot.lane.b32.xlu1 %v2547_v44, %s2550_s21 }
0x13f5   :  { %2043 = vrot.lane.b32.xlu0 %v2041_v39, %s2551_s1 }
0x1451   :  { %v2049_v40 = vpop.permute.xlu1 %2048 }
0x1465   :  { %v2053_v48 = vpop.permute.xlu1 %2052 }
0x1467   :  { %v2044_v41 = vpop.permute.xlu0 %2043 }
0x1468   :  { %v2046_v43 = vadd.f32 %v2044_v41, %v2029_v34 }
0x146a   :  { %v2056_v50 = vsel %vm2055_vm4, %v2046_v43, %v2049_v40 }
0x146b   :  { %v2058_v42 = vsel %vm2057_vm5, %v2056_v50, %v2053_v48 }
0x146c   :  { %2060 = vst.msk [vmem:[%s3026_s4] sm:$0xff] %vm2059_vm6, %v2058_v42 }

</bundles_post_ra>
